<compile_context>
chip_gen: v5e
topology: v5e:2x2
jax: 0.10.0
libtpu: 0.0.40
codegen_flags: <defaults>
</compile_context>

<pallas_src>
import functools

import jax
import jax.numpy as jnp
from jax.experimental import pallas as pl
from jax.experimental.pallas import tpu as pltpu


def _round_up(x, m):
    return (x + m - 1) // m * m


def _pick_col_tile(total_cols, max_tile=512):
    """Column tile for the fused (E, 3E) weight: multiple of 128 dividing 3E."""
    if total_cols % 128 != 0:
        return total_cols                      # small / toy shapes: full width
    for tn in (512, 384, 256, 128):
        if tn <= max_tile and total_cols % tn == 0:
            return tn
    return total_cols


# ---------------------------------------------------------------------------
# Kernels
# ---------------------------------------------------------------------------
def _qkv_fused_kernel(x_ref, w_ref, b_ref, out_ref):
    """Hot path: one bf16 MXU matmul against the pre-permuted fused weight.

    x:  (TM, E) f32  (cast to bf16 on the VPU here)
    w:  (E, TN) bf16 column tile of W_fused (columns already interleaved)
    b:  (1, TN) f32
    out:(TM, TN) full-width, lane-dense store.
    """
    x = x_ref[...].astype(jnp.bfloat16)
    acc = jnp.dot(x, w_ref[...], preferred_element_type=jnp.float32)
    out_ref[...] = (acc + b_ref[...]).astype(out_ref.dtype)


def _qkv_general_kernel(xq_ref, xk_ref, xv_ref, w_ref, b_ref, out_ref, *,
                        num_heads, head_size):
    """Distinct q/k/v: three matmuls + in-register interleave, ONE store.

    xq/xk/xv: (TM, E) f32    w: (3, E, E) bf16 (in, out)    b: (3, 1, E) f32
    out: (TM, 3E) in [q_h | k_h | v_h]*H order.
    """
    q = jnp.dot(xq_ref[...].astype(jnp.bfloat16), w_ref[0],
                preferred_element_type=jnp.float32) + b_ref[0]
    k = jnp.dot(xk_ref[...].astype(jnp.bfloat16), w_ref[1],
                preferred_element_type=jnp.float32) + b_ref[1]
    v = jnp.dot(xv_ref[...].astype(jnp.bfloat16), w_ref[2],
                preferred_element_type=jnp.float32) + b_ref[2]

    hd = head_size
    parts = []
    for h in range(num_heads):
        s = slice(h * hd, (h + 1) * hd)
        parts.extend((q[:, s], k[:, s], v[:, s]))
    # Single full-width unmasked store instead of 3*H masked 64-lane stores.
    out_ref[...] = jnp.concatenate(parts, axis=-1).astype(out_ref.dtype)


# ---------------------------------------------------------------------------
# pallas_call wrappers
# ---------------------------------------------------------------------------
def _fused_call(x, w_fused, b_fused, *, tm, out_dtype):
    l_pad, E = x.shape
    cols = w_fused.shape[1]                   # 3E
    tn = _pick_col_tile(cols)
    grid = (l_pad // tm, cols // tn)

    out_itemsize = jnp.dtype(out_dtype).itemsize
    vmem_est = (2 * tm * E * 4            # x (f32, double-buffered)
                + 2 * E * tn * 2          # weight column tiles (bf16)
                + 2 * tn * 4              # bias tiles
                + 2 * tm * tn * out_itemsize)
    vmem_limit = int(min(64 * 1024 * 1024, max(32 * 1024 * 1024, 2 * vmem_est)))

    return pl.pallas_call(
        _qkv_fused_kernel,
        out_shape=jax.ShapeDtypeStruct((l_pad, cols), out_dtype),
        grid=grid,
        in_specs=[
            pl.BlockSpec((tm, E), lambda i, j: (i, 0)),   # x resident across j
            pl.BlockSpec((E, tn), lambda i, j: (0, j)),   # weight cols stream
            pl.BlockSpec((1, tn), lambda i, j: (0, j)),
        ],
        out_specs=pl.BlockSpec((tm, tn), lambda i, j: (i, j)),
        compiler_params=pltpu.CompilerParams(
            dimension_semantics=("parallel", "arbitrary"),
            vmem_limit_bytes=vmem_limit),
    )(x, w_fused, b_fused)


def _general_call(xq, xk, xv, w_qkv, b_qkv, *, tm, num_heads, head_size,
                  out_dtype, single_buffer_weights):
    l_pad, E = xq.shape
    grid = (l_pad // tm,)

    resident_kwargs = (dict(pipeline_mode=pl.Buffered(1))
                       if single_buffer_weights else {})
    x_spec = pl.BlockSpec((tm, E), lambda i: (i, 0))
    w_spec = pl.BlockSpec((3, E, E), lambda i: (0, 0, 0), **resident_kwargs)
    b_spec = pl.BlockSpec((3, 1, E), lambda i: (0, 0, 0), **resident_kwargs)
    out_spec = pl.BlockSpec((tm, 3 * E), lambda i: (i, 0))

    kernel = functools.partial(_qkv_general_kernel,
                               num_heads=num_heads, head_size=head_size)

    n_wbuf = 1 if single_buffer_weights else 2
    out_itemsize = jnp.dtype(out_dtype).itemsize
    vmem_est = (3 * 2 * tm * E * 4
                + n_wbuf * 3 * E * E * 2
                + n_wbuf * 3 * E * 4
                + 2 * tm * 3 * E * out_itemsize)
    vmem_limit = int(min(64 * 1024 * 1024, max(32 * 1024 * 1024, 2 * vmem_est)))

    return pl.pallas_call(
        kernel,
        out_shape=jax.ShapeDtypeStruct((l_pad, 3 * E), out_dtype),
        grid=grid,
        in_specs=[x_spec, x_spec, x_spec, w_spec, b_spec],
        out_specs=out_spec,
        compiler_params=pltpu.CompilerParams(
            dimension_semantics=("parallel",),
            vmem_limit_bytes=vmem_limit),
    )(xq, xk, xv, w_qkv, b_qkv)


def vit_attention_forward(query, key, value, params, num_heads, *,
                          tile_m=128, out_dtype=jnp.float32):
    """Reproduces ViT_Attention.forward: returns PMHA_IN of shape (L, N, 3E, 1, 1).

    tile_m=128 keeps >=2 L-grid steps for ViT-B (v7x megacore) and matches the
    v5e MXU; bump to 256 on v6e if desired.  out_dtype=jnp.bfloat16 halves
    writeback if downstream tolerates it.
    """
    L, N, E = query.shape
    assert N == 1, "batch is 1"
    assert query.shape == key.shape == value.shape
    assert E % num_heads == 0, "embed_dim must be divisible by num_heads"
    head_size = E // num_heads

    tm = min(tile_m, _round_up(L, 8))
    l_pad = _round_up(L, tm)

    def prep(x):
        x2 = x.reshape(L, E)                    # keep f32; cast inside kernel
        if l_pad != L:
            x2 = jnp.pad(x2, ((0, l_pad - L), (0, 0)))
        return x2

    # Hot path: self-attention (same array passed for q/k/v, as in infer.py).
    if (key is query) and (value is query):
        out = _fused_call(prep(query), params["w_fused"], params["b_fused"],
                          tm=tm, out_dtype=out_dtype)
    else:
        xq, xk, xv = prep(query), prep(key), prep(value)
        try:
            out = _general_call(xq, xk, xv, params["w_qkv"], params["b_qkv"],
                                tm=tm, num_heads=num_heads, head_size=head_size,
                                out_dtype=out_dtype, single_buffer_weights=True)
        except Exception:
            # Fallback if this JAX/Mosaic build rejects pl.Buffered(1)
            # (single-buffered resident weights); semantics are identical.
            out = _general_call(xq, xk, xv, params["w_qkv"], params["b_qkv"],
                                tm=tm, num_heads=num_heads, head_size=head_size,
                                out_dtype=out_dtype, single_buffer_weights=False)

    if l_pad != L:
        out = out[:L]          # padded rows (bias only) are dropped here
    # Metadata-only reshape to the PyTorch return shape (L, N, 3E, 1, 1).
    return out.reshape(L, N, 3 * E, 1, 1)


# ---------------------------------------------------------------------------
# Params / reference
# ---------------------------------------------------------------------------
def init_params(key, embed_dim, num_heads):
    """Deterministic synthetic Linear weights.

    PyTorch Linear stores (out, in); we store the transpose (in, out) so the
    kernels compute y = x @ W + b.  The fused weight/bias have their columns
    pre-permuted into the interleaved [q_h | k_h | v_h]*H output order.  The
    `out` Linear of __init__ is unused by forward().
    """
    E, H = embed_dim, num_heads
    hd = E // H
    ks = jax.random.split(key, 6)
    scale = 1.0 / jnp.sqrt(jnp.float32(E))
    mk_w = lambda k: jax.random.uniform(k, (E, E), jnp.float32, -1.0, 1.0) * scale
    mk_b = lambda k: jax.random.uniform(k, (1, E), jnp.float32, -1.0, 1.0) * scale
    wq, wk, wv = mk_w(ks[0]), mk_w(ks[1]), mk_w(ks[2])
    bq, bk, bv = mk_b(ks[3]), mk_b(ks[4]), mk_b(ks[5])

    w_stack = jnp.stack([wq, wk, wv])                       # (3, E, E)
    b_stack = jnp.stack([bq, bk, bv])                       # (3, 1, E)
    # Column c = 3*h*hd + s*hd + d  <-  projection s, column h*hd + d.
    w_fused = (w_stack.reshape(3, E, H, hd)
               .transpose(1, 2, 0, 3)                       # (in, h, s, d)
               .reshape(E, 3 * E))
    b_fused = (b_stack.reshape(3, H, hd)
               .transpose(1, 0, 2)
               .reshape(1, 3 * E))

    return {
        "wq": wq, "bq": bq, "wk": wk, "bk": bk, "wv": wv, "bv": bv,   # f32 ref
        "w_qkv": w_stack.astype(jnp.bfloat16),               # (3, E, E) bf16
        "b_qkv": b_stack,                                     # (3, 1, E) f32
        "w_fused": w_fused.astype(jnp.bfloat16),              # (E, 3E) bf16
        "b_fused": b_fused,                                    # (1, 3E) f32
    }


def _reference(query, key, value, params, num_heads):
    """Pure-JAX f32 reference mirroring the PyTorch forward() exactly."""
    L, N, E = query.shape
    hd = E // num_heads
    x2 = lambda x: x.reshape(L, E)
    mq = x2(query) @ params["wq"] + params["bq"]
    mk = x2(key) @ params["wk"] + params["bk"]
    mv = x2(value) @ params["wv"] + params["bv"]
    col = jnp.concatenate(
        [mq.reshape(-1, hd), mk.reshape(-1, hd), mv.reshape(-1, hd)], axis=1)
    return col.reshape(L, N, -1, 1, 1)


if __name__ == "__main__":
    L, N, E, H = 8, 1, 32, 4            # seq=8, batch=1, hidden=32, heads=4
    root = jax.random.PRNGKey(0)
    k_in, k_par = jax.random.split(root)
    kx, kk, kv = jax.random.split(k_in, 3)

    x = jax.random.normal(kx, (L, N, E), jnp.float32)
    params = init_params(k_par, E, H)

    # Hot path: query is key is value -> fused single-matmul kernel.
    out_self = jax.block_until_ready(vit_attention_forward(x, x, x, params, H))
    ref_self = _reference(x, x, x, params, H)
    assert out_self.shape == (L, N, 3 * E, 1, 1), out_self.shape
    # bf16 operands / f32 accumulation vs pure-f32 reference -> loose tolerance.
    assert jnp.allclose(out_self, ref_self, atol=3e-2, rtol=3e-2), (
        float(jnp.max(jnp.abs(out_self - ref_self))))

    # General path: distinct query/key/value.
    key_ = jax.random.normal(kk, (L, N, E), jnp.float32)
    value = jax.random.normal(kv, (L, N, E), jnp.float32)
    out_gen = jax.block_until_ready(
        vit_attention_forward(x, key_, value, params, H))
    ref_gen = _reference(x, key_, value, params, H)
    assert out_gen.shape == (L, N, 3 * E, 1, 1), out_gen.shape
    assert jnp.allclose(out_gen, ref_gen, atol=3e-2, rtol=3e-2), (
        float(jnp.max(jnp.abs(out_gen - ref_gen))))

    print("KERNEL_OK")
</pallas_src>

<mosaic_0001>
module attributes {stable_mosaic.version = 11 : i64} {
  func.func @_qkv_fused_kernel(%arg0: i32, %arg1: i32, %arg2: memref<8x32xf32, #tpu.memory_space<vmem>>, %arg3: memref<32x96xbf16, #tpu.memory_space<vmem>>, %arg4: memref<1x96xf32, #tpu.memory_space<vmem>>, %arg5: memref<8x96xf32, #tpu.memory_space<vmem>>) attributes {dimension_semantics = [#tpu.dimension_semantics<parallel>, #tpu.dimension_semantics<arbitrary>], iteration_bounds = array<i64: 1, 1>, scalar_prefetch = 0 : i64, scratch_operands = 0 : i64, tpu.core_type = #tpu.core_type<tc>, window_params = [{transform_indices = @transform_0, window_bounds = array<i64: 8, 32>}, {transform_indices = @transform_1, window_bounds = array<i64: 32, 96>}, {transform_indices = @transform_2, window_bounds = array<i64: 1, 96>}, {transform_indices = @transform_3, window_bounds = array<i64: 8, 96>}]} {
    %c0 = arith.constant 0 : index
    %c0_0 = arith.constant 0 : index
    %0 = vector.load %arg2[%c0, %c0_0] : memref<8x32xf32, #tpu.memory_space<vmem>>, vector<8x32xf32>
    %1 = arith.truncf %0 : vector<8x32xf32> to vector<8x32xbf16>
    %c0_1 = arith.constant 0 : index
    %c0_2 = arith.constant 0 : index
    %2 = vector.load %arg3[%c0_1, %c0_2] : memref<32x96xbf16, #tpu.memory_space<vmem>>, vector<32x96xbf16>
    %cst = arith.constant dense<0.000000e+00> : vector<8x96xf32>
    %3 = tpu.matmul %1, %2, %cst {dimension_numbers = #tpu.dot_dimension_numbers<[1], [0], [0], [1], [0, 0, 1, 1], [], []>} : vector<8x32xbf16>, vector<32x96xbf16>, vector<8x96xf32> -> vector<8x96xf32>
    %c0_3 = arith.constant 0 : index
    %c0_4 = arith.constant 0 : index
    %4 = vector.load %arg4[%c0_3, %c0_4] : memref<1x96xf32, #tpu.memory_space<vmem>>, vector<1x96xf32>
    %5 = vector.broadcast %4 : vector<1x96xf32> to vector<8x96xf32>
    %6 = arith.addf %3, %5 : vector<8x96xf32>
    %c0_5 = arith.constant 0 : index
    %c0_6 = arith.constant 0 : index
    %7 = vector.load %arg5[%c0_5, %c0_6] : memref<8x96xf32, #tpu.memory_space<vmem>>, vector<8x96xf32>
    tpu.vector_store %arg5[%c0_5, %c0_6], %6 {strides = array<i32>} : memref<8x96xf32, #tpu.memory_space<vmem>>, vector<8x96xf32>,
    return
  }
  func.func @transform_0(%arg0: i32, %arg1: i32) -> (i32, i32) {
    %c0_i32 = arith.constant 0 : i32
    %c0_i32_0 = arith.constant 0 : i32
    return %arg0, %c0_i32 : i32, i32
  }
  func.func @transform_1(%arg0: i32, %arg1: i32) -> (i32, i32) {
    %c0_i32 = arith.constant 0 : i32
    %c0_i32_0 = arith.constant 0 : i32
    return %c0_i32, %arg1 : i32, i32
  }
  func.func @transform_2(%arg0: i32, %arg1: i32) -> (i32, i32) {
    %c0_i32 = arith.constant 0 : i32
    %c0_i32_0 = arith.constant 0 : i32
    return %c0_i32, %arg1 : i32, i32
  }
  func.func @transform_3(%arg0: i32, %arg1: i32) -> (i32, i32) {
    %c0_i32 = arith.constant 0 : i32
    return %arg0, %arg1 : i32, i32
  }
}

</mosaic_0001>

<bundles_post_ra>
// kernel: tpu_custom_call.1
= control target key start
LH: loop header
LB: loop body
LE: loop exit
PB: predicated region body
PF: predicated region fallthrough
CT: control target
= control target key end

     0   :  { %8 = vsyncpa [#allocation3], 0  ;;  %s237_s0 = inlined_call_operand.hbm [shape: f32[8,32], index: 0, kind: input, shape index: {}]   ;;  %s238_s1 = inlined_call_operand.hbm [shape: bf16[32,96], index: 1, kind: input, shape index: {}]   ;;  %s239_s2 = inlined_call_operand.vmem [shape: f32[1,96], index: 2, kind: input, shape index: {}]   ;;  %s240_s3 = inlined_call_operand.hbm [shape: f32[8,96], index: 3, kind: output, shape index: {}]  }
   0x1   :  { %9 = vsyncpa [#allocation6], 0 }
   0x2   :  { %10 = vsyncpa [#allocation4], 0  ;;  %s16_s14 = sshll.u32 %s237_s0, 4  ;;  %s200_s15 = smov [#allocation2]   ;;  %s17_s14 = int_to_ptr.hbm [resolvable:$true] %s16_s14 }
   0x3   :  { %s18_s16 = sshll.u32 %s200_s15, 4  ;;  %s26_s19 = sshll.u32 %s238_s1, 4  ;;  %s19_s16 = int_to_ptr.vmem [resolvable:$true] %s18_s16  ;;  %s27_s19 = int_to_ptr.hbm [resolvable:$true] %s26_s19 }
   0x4   :  { %21 = dma.hbm_to_vmem [thread:$0]  %s17_s14, 128, %s19_s16, [#allocation3]  }
   0x5   :  { %s201_s20 = smov [#allocation5]   ;;  %s202_s22 = smov 64  }
   0x6   :  { %s28_s21 = sshll.u32 %s201_s20, 4  ;;  %s203_s23 = smov 4   ;;  %s29_s21 = int_to_ptr.vmem [resolvable:$true] %s28_s21 }
   0x7   :  { %34 = dma.hbm_to_vmem [thread:$0]  %s27_s19, 256, %s29_s21, [#allocation6], %s202_s22, %s202_s22, %s203_s23  }
   0x8   :  { %194 = dma.done.wait [#allocation3], 128  }
   0x9   :  { %195 = vsyncadd [#allocation3], 4294967168 }
   0xa   :  { %196 = dma.done.wait [#allocation6], 256  }
   0xb   :  { %197 = vsyncadd [#allocation6], 4294967040  ;;  %v115_v0 = vld [vmem:[#allocation5 + $0x8] sm:$0xff]  ;;  %v114_v1 = vld [vmem:[#allocation5] sm:$0xff]  ;;  %vm68_vm0 = vcmask 261120   ;;  %s204_s24 = smov [#allocation7]  }
   0xc   :  { %78 = vmatpush.bf16.msra.mxu0 %v115_v0  ;;  %v46_v2 = vld [vmem:[#allocation2] sm:$0xff]  ;;  %s92_s25 = sshll.u32 %s204_s24, 4  ;;  %s94_s28 = sshll.u32 %s240_s3, 4  ;;  %vm85_vm1 = vcmask 785408   ;;  %s93_s25 = int_to_ptr.vmem [resolvable:$true] %s92_s25  ;;  %s95_s28 = int_to_ptr.hbm [resolvable:$true] %s94_s28 }
   0xd   :  { %v47_v3 = vpack.c.bf16 %v46_v2, %v46_v2  ;;  %v121_v4 = vld [vmem:[%s239_s2] ss:$0 sm:$0xff] }
  0x10   :  { %79 = vmatpush.bf16.msra.mxu0 %v114_v1 }
  0x13   :  { %113 = vmatmul.msk.bf16.vlgmr.msra.gmra.mxu0 %vm68_vm0, %v47_v3 }
  0x90   :  { %v81_v5 = vpop.f32.mrf.mxu0 }
  0x91   :  { %v82_v6 = vadd.f32 %v121_v4, %v81_v5 }
  0x93   :  { %86 = vst.msk [vmem:[#allocation7] sm:$0xff] %vm85_vm1, %v82_v6 }
  0x94   :  { %97 = dma.vmem_to_hbm [thread:$0]  %s93_s25, 128, %s95_s28, [#allocation4]  }
  0x98   :  { %v83_v7 = vpop.f32.mrf.mxu0 }
  0x99   :  { %198 = dma.done.wait [#allocation4], 128  }
  0x9a   :  { %199 = vsyncadd [#allocation4], 4294967168 }
  0x9b   :  { %102 = vsyncpa [#allocation3], 1 }
  0x9c   :  { %103 = vsyncpa [#allocation6], 1 }
  0x9d   :  { %104 = vsyncpa [#allocation4], 1 }

</bundles_post_ra>
